<compile_context>
chip_gen: v7x
topology: tpu7x:2x2x1
jax: 0.10.0
libtpu: 0.0.40
codegen_flags: <defaults>
</compile_context>

<pallas_src>
import jax
import jax.numpy as jnp
from jax.experimental import pallas as pl
from jax.experimental.pallas import tpu as pltpu

D_IN = 4
D_HIDDEN = 16
LANE = 128


def fusionnet_kernel(xt_ref, w1_ref, b1_ref, w2t_ref, b2_ref, o_ref):
    # Layer 1 on the MXU: (16, 4) @ (4, TB) -> (16, TB), f32 accumulation.
    h = jnp.dot(w1_ref[...], xt_ref[...], preferred_element_type=jnp.float32)
    # Bias + ReLU on the VPU; (16, 1) bias broadcasts over the lane (batch) axis.
    h = jnp.maximum(h + b1_ref[...], 0.0)
    # Layer 2 (N=1): per-lane multiply + sublane reduction (XLU); keeps MXU free.
    o = jnp.sum(h * w2t_ref[...], axis=0, keepdims=True)          # (1, TB) f32
    o_ref[...] = (o + b2_ref[0]).astype(o_ref.dtype)


def fusionnet_forward(x, w1, b1, w2t, b2, *,
                      tile_b=256 * 1024,
                      vmem_limit_bytes=48 * 1024 * 1024):
    """PyTorch FusionNet semantics: x (B, 4) float32 -> (B, 1) float32."""
    B, d_in = x.shape
    assert d_in == D_IN

    # Lane-dense layout + bf16 reads. Under jit, allow_input_fusion lets XLA
    # fuse this transpose/convert into the pallas input (no extra HBM pass).
    # TODO(synk): if the upstream producer can emit x as (4, B) bf16 directly,
    # pass it through and drop this line.
    x_t = x.T.astype(jnp.bfloat16)                    # (4, B)
    w1_bf = w1.astype(jnp.bfloat16)                   # tiny; constant-folded under jit

    tb = min(tile_b, pl.cdiv(B, LANE) * LANE)         # lane-aligned batch tile
    grid = (pl.cdiv(B, tb),)                          # partial last block is fine here

    out_t = pl.pallas_call(
        fusionnet_kernel,
        out_shape=jax.ShapeDtypeStruct((1, B), jnp.float32),
        grid=grid,
        in_specs=[
            pl.BlockSpec((D_IN, tb), lambda i: (0, i)),          # x tile (pipelined)
            pl.BlockSpec((D_HIDDEN, D_IN), lambda i: (0, 0)),    # weights VMEM-resident
            pl.BlockSpec((D_HIDDEN, 1), lambda i: (0, 0)),
            pl.BlockSpec((D_HIDDEN, 1), lambda i: (0, 0)),
            pl.BlockSpec(memory_space=pltpu.MemorySpace.SMEM),   # b2 scalar in SMEM
        ],
        out_specs=pl.BlockSpec((1, tb), lambda i: (0, i)),       # lane-dense stores
        compiler_params=pltpu.CompilerParams(
            dimension_semantics=("parallel",),        # 2-TC split on v7x; no-op v5e/v6e
            vmem_limit_bytes=vmem_limit_bytes,
            allow_input_fusion=[True, False, False, False, False],
        ),
        cost_estimate=pl.CostEstimate(
            flops=192 * B, bytes_accessed=12 * B + 256, transcendentals=0),
    )(x_t, w1_bf, b1, w2t, b2)

    return out_t.T                                    # back to PyTorch (B, 1)


def init_params(key, input_dim=D_IN, hidden_dim=D_HIDDEN):
    """Deterministic init mimicking torch.nn.Linear (uniform(+-1/sqrt(fan_in)))."""
    k1, k2, k3, k4 = jax.random.split(key, 4)
    bound1 = 1.0 / jnp.sqrt(jnp.float32(input_dim))
    bound2 = 1.0 / jnp.sqrt(jnp.float32(hidden_dim))
    # w1 kept PyTorch-native (out, in); b1/w2 as column vectors so the kernel's
    # sublane broadcast/reduction needs no reshape; b2 as a flat scalar (SMEM).
    w1 = jax.random.uniform(k1, (hidden_dim, input_dim), jnp.float32, -bound1, bound1)
    b1 = jax.random.uniform(k2, (hidden_dim, 1), jnp.float32, -bound1, bound1)
    w2t = jax.random.uniform(k3, (hidden_dim, 1), jnp.float32, -bound2, bound2)
    b2 = jax.random.uniform(k4, (1,), jnp.float32, -bound2, bound2)
    return w1, b1, w2t, b2


if __name__ == "__main__":
    batch = 8

    key = jax.random.PRNGKey(0)
    kx, kp = jax.random.split(key)
    x = jax.random.normal(kx, (batch, D_IN), jnp.float32)
    w1, b1, w2t, b2 = init_params(kp)

    fwd = jax.jit(fusionnet_forward)   # jit so the transpose/cast fuses into the call
    out = jax.block_until_ready(fwd(x, w1, b1, w2t, b2))

    # Pure-JAX reference with the same bf16 rounding of the layer-1 operands.
    x_bf = x.astype(jnp.bfloat16).astype(jnp.float32)
    w1_bf = w1.astype(jnp.bfloat16).astype(jnp.float32)
    h_ref = jnp.maximum(x_bf @ w1_bf.T + b1.reshape(1, -1), 0.0)
    ref = h_ref @ w2t + b2.reshape(1, 1)

    assert out.shape == (batch, 1)
    assert jnp.allclose(out, ref, atol=1e-4, rtol=1e-4), (
        f"max abs err {jnp.max(jnp.abs(out - ref))}")

    print("KERNEL_OK")
</pallas_src>

<mosaic_0001>
module attributes {stable_mosaic.version = 11 : i64} {
  func.func @fusionnet_kernel(%arg0: i32, %arg1: memref<4x128xbf16, #tpu.memory_space<vmem>>, %arg2: memref<16x4xbf16, #tpu.memory_space<vmem>>, %arg3: memref<16x1xf32, #tpu.memory_space<vmem>>, %arg4: memref<16x1xf32, #tpu.memory_space<vmem>>, %arg5: memref<1xf32, #tpu.memory_space<smem>>, %arg6: memref<1x128xf32, #tpu.memory_space<vmem>>) attributes {dimension_semantics = [#tpu.dimension_semantics<parallel>], iteration_bounds = array<i64: 1>, scalar_prefetch = 0 : i64, scratch_operands = 0 : i64, tpu.core_type = #tpu.core_type<tc>, window_params = [{transform_indices = @transform_0, window_bounds = array<i64: 4, 128>}, {pipeline_mode = #tpu.pipeline_mode<synchronous>, transform_indices = @transform_1, window_bounds = array<i64: 16, 4>}, {pipeline_mode = #tpu.pipeline_mode<synchronous>, transform_indices = @transform_2, window_bounds = array<i64: 16, 1>}, {pipeline_mode = #tpu.pipeline_mode<synchronous>, transform_indices = @transform_3, window_bounds = array<i64: 16, 1>}, {transform_indices = @transform_4, window_bounds = array<i64: 1>}, {transform_indices = @transform_5, window_bounds = array<i64: 1, 128>}]} {
    %c0 = arith.constant 0 : index
    %c0_0 = arith.constant 0 : index
    %0 = vector.load %arg2[%c0, %c0_0] : memref<16x4xbf16, #tpu.memory_space<vmem>>, vector<16x4xbf16>
    %c0_1 = arith.constant 0 : index
    %c0_2 = arith.constant 0 : index
    %1 = vector.load %arg1[%c0_1, %c0_2] : memref<4x128xbf16, #tpu.memory_space<vmem>>, vector<4x128xbf16>
    %cst = arith.constant dense<0.000000e+00> : vector<16x128xf32>
    %2 = tpu.matmul %0, %1, %cst {dimension_numbers = #tpu.dot_dimension_numbers<[1], [0], [0], [1], [0, 0, 1, 1], [], []>} : vector<16x4xbf16>, vector<4x128xbf16>, vector<16x128xf32> -> vector<16x128xf32>
    %c0_3 = arith.constant 0 : index
    %c0_4 = arith.constant 0 : index
    %3 = vector.load %arg3[%c0_3, %c0_4] : memref<16x1xf32, #tpu.memory_space<vmem>>, vector<16x1xf32>
    %4 = vector.broadcast %3 : vector<16x1xf32> to vector<16x128xf32>
    %5 = arith.addf %2, %4 : vector<16x128xf32>
    %cst_5 = arith.constant 0.000000e+00 : f32
    %6 = vector.broadcast %cst_5 : f32 to vector<16x128xf32>
    %7 = arith.maximumf %5, %6 : vector<16x128xf32>
    %c0_6 = arith.constant 0 : index
    %c0_7 = arith.constant 0 : index
    %8 = vector.load %arg4[%c0_6, %c0_7] : memref<16x1xf32, #tpu.memory_space<vmem>>, vector<16x1xf32>
    %9 = vector.broadcast %8 : vector<16x1xf32> to vector<16x128xf32>
    %10 = arith.mulf %7, %9 : vector<16x128xf32>
    %cst_8 = arith.constant dense<0.000000e+00> : vector<128xf32>
    %11 = vector.multi_reduction <add>, %10, %cst_8 [0] : vector<16x128xf32> to vector<128xf32>
    %12 = vector.shape_cast %11 : vector<128xf32> to vector<1x128xf32>
    %c0_9 = arith.constant 0 : index
    %13 = memref.load %arg5[%c0_9] : memref<1xf32, #tpu.memory_space<smem>>
    %14 = vector.broadcast %13 : f32 to vector<1x128xf32>
    %15 = arith.addf %12, %14 : vector<1x128xf32>
    %c0_10 = arith.constant 0 : index
    %c0_11 = arith.constant 0 : index
    %16 = vector.load %arg6[%c0_10, %c0_11] : memref<1x128xf32, #tpu.memory_space<vmem>>, vector<1x128xf32>
    tpu.vector_store %arg6[%c0_10, %c0_11], %15 {strides = array<i32>} : memref<1x128xf32, #tpu.memory_space<vmem>>, vector<1x128xf32>,
    return
  }
  func.func @transform_0(%arg0: i32) -> (i32, i32) {
    %c0_i32 = arith.constant 0 : i32
    %c0_i32_0 = arith.constant 0 : i32
    return %c0_i32, %arg0 : i32, i32
  }
  func.func @transform_1(%arg0: i32) -> (i32, i32) {
    %c0_i32 = arith.constant 0 : i32
    %c0_i32_0 = arith.constant 0 : i32
    %c0_i32_1 = arith.constant 0 : i32
    return %c0_i32, %c0_i32_0 : i32, i32
  }
  func.func @transform_2(%arg0: i32) -> (i32, i32) {
    %c0_i32 = arith.constant 0 : i32
    %c0_i32_0 = arith.constant 0 : i32
    %c0_i32_1 = arith.constant 0 : i32
    return %c0_i32, %c0_i32_0 : i32, i32
  }
  func.func @transform_3(%arg0: i32) -> (i32, i32) {
    %c0_i32 = arith.constant 0 : i32
    %c0_i32_0 = arith.constant 0 : i32
    %c0_i32_1 = arith.constant 0 : i32
    return %c0_i32, %c0_i32_0 : i32, i32
  }
  func.func @transform_4(%arg0: i32) -> i32 {
    %c0_i32 = arith.constant 0 : i32
    %c0_i32_0 = arith.constant 0 : i32
    return %c0_i32 : i32
  }
  func.func @transform_5(%arg0: i32) -> (i32, i32) {
    %c0_i32 = arith.constant 0 : i32
    %c0_i32_0 = arith.constant 0 : i32
    return %c0_i32, %arg0 : i32, i32
  }
}

</mosaic_0001>

<bundles_post_ra>
// kernel: fusionnet_forward.2
= control target key start
LH: loop header
LB: loop body
LE: loop exit
PB: predicated region body
PF: predicated region fallthrough
CT: control target
= control target key end

     0   :  { %v181_v1 = vmov 0.0   ;;  %vm182_vm0 = vmmov 0   ;;  %v183_v3 = vmov 0   ;;  %s248_s0 = inlined_call_operand.vmem [shape: bf16[16,4], index: 0, kind: input, shape index: {}]   ;;  %s249_s1 = inlined_call_operand.vmem [shape: f32[16,1], index: 1, kind: input, shape index: {}]   ;;  %s250_s2 = inlined_call_operand.vmem [shape: f32[16,1], index: 2, kind: input, shape index: {}]   ;;  %s251_s3 = inlined_call_operand.<no memory space> [shape: f32[1], index: 3, kind: input, shape index: {}]   ;;  %s252_s4 = inlined_call_operand.vmem [shape: f32[8,4], index: 4, kind: input, shape index: {}]   ;;  %s253_s5 = inlined_call_operand.hbm [shape: f32[1,8], index: 5, kind: output, shape index: {}]  }
   0x1   :  { %v22_v0 = vld [vmem:[%s252_s4] sm:$0xf]  ;;  %144 = vmatprep.subr.bf16.mxu0 %v181_v1  ;;  %146 = vmatprep.mubr.msk.bf16.mxu0 %vm182_vm0, %v181_v1 }
   0x2   :  { %v26_v2 = vpack.c.bf16 %v181_v1, %v22_v0  ;;  %154 = vset.pattern.permute.xlu0 %v183_v3  ;;  %v33_v4 = vld [vmem:[%s249_s1] sm:$0xff]  ;;  %155 = vset.pattern.permute.xlu1 %v183_v3 }
   0x3   :  { %v101_v5 = vld [vmem:[%s250_s2] sm:$0xff]  ;;  %37 = vperm.xlu0 %154, %v33_v4  }
   0x4   :  { %28 = vst [vmem:[#allocation5] sm:$0x3] %v26_v2  ;;  %105 = vperm.xlu1 %155, %v101_v5  }
   0x5   :  { %11 = vsyncpa [#allocation4], 0  ;;  %v34_v6 = vld [vmem:[%s249_s1 + $0x8] sm:$0xff]  ;;  %vm54_vm1 = vcmask 1041408   ;;  %v156_v10 = vld [vmem:[%s248_s0] sm:$0xff]   ;;  %vm50_vm2 = vcmask 31744   ;;  %v123_v31 = vstv %s251_s3 }
   0x6   :  { %v102_v7 = vld [vmem:[%s250_s2 + $0x8] sm:$0xff]  ;;  %s184_s2 = smov [#allocation3]  }
   0x7   :  { %42 = vperm.xlu0 %154, %v34_v6   ;;  %s132_s29 = sshll.u32 %s184_s2, 4  ;;  %s133_s29 = int_to_ptr.vmem [resolvable:$true] %s132_s29 }
   0x8   :  { %110 = vperm.xlu1 %155, %v102_v7   ;;  %s157_s30 = scalar_lea.vmem %s133_s29, 16  ;;  %s161_s6 = scalar_lea.vmem %s133_s29, 32 }
   0x9   :  { %p158_p0 = scmp.ne.s32.totalorder %s133_s29, %s157_s30  ;;  %p162_p1 = scmp.lt.s32.totalorder %s133_s29, %s133_s29 }
   0xa   :  { %p163_p2 = scmp.lt.s32.totalorder %s161_s6, %s157_s30 }
   0xb   :  { %v32_v8 = vld [vmem:[#allocation5] sm:$0x3] }
   0xc   :  { %v56_v9 = vsel %vm54_vm1, %v32_v8, 0  ;;  %p164_p3 = por %p163_p2, %p162_p1 }
   0xd   :  { %145 = vmatpush3.bf16.msra.mxu0 %v56_v9 }
   0xe   :  { %p165_p4 = pnand %p164_p3, %p158_p0 }
  0x10   :  { %147 = vmatmul.mubr.msk.bf16.vlgmr.msra.gmra.mrb[0].mxu0 %vm50_vm2, %v156_v10 }
  0x82   :  { %v38_v11 = vpop.permute.xlu0 %37 }
  0x83   :  { %v106_v12 = vpop.permute.xlu1 %105 }
  0x86   :  { %v43_v16 = vpop.permute.xlu0 %42 }
  0x87   :  { %v111_v22 = vpop.permute.xlu1 %110 }
  0xe3   :  { %v92_v13 = vpop.f32.mrb[0].mxu0 }
  0xe4   :  { %v93_v14 = vadd.f32 %v92_v13, %v38_v11  ;;  %v148_v15 = vpop.f32.mrb[1].mxu0 }
  0xe5   :  { %v95_v17 = vpop.f32.mrb[2].mxu0 }
  0xe6   :  { %v99_v18 = vmax.f32 %v93_v14, 0.0  ;;  %v96_v19 = vadd.f32 %v95_v17, %v43_v16  ;;  %v149_v20 = vpop.f32.mrb[3].mxu0 }
  0xe8   :  { %v100_v21 = vmax.f32 %v96_v19, 0.0  ;;  %v113_v23 = vmul.f32 %v106_v12, %v99_v18 }
  0xea   :  { %v114_v24 = vmul.f32 %v111_v22, %v100_v21 }
  0xec   :  { %v115_v25 = vadd.f32 %v114_v24, %v113_v23 }
  0xee   :  { %v116_v26 = vrot.slane %v115_v25, 4 }
  0xf0   :  { %v117_v27 = vadd.f32 %v116_v26, %v115_v25 }
  0xf2   :  { %v118_v28 = vrot.slane %v117_v27, 2 }
  0xf4   :  { %v119_v29 = vadd.f32 %v118_v28, %v117_v27 }
  0xf6   :  { %v120_v30 = vrot.slane %v119_v29, 1 }
  0xf8   :  { %v121_v32 = vadd.f32 %v120_v30, %v119_v29 }
  0xfa   :  { %v124_v33 = vadd.f32 %v123_v31, %v121_v32 }
  0xfc   :  { %125 = vst [vmem:[#allocation3] sm:$0x1] %v124_v33 }
  0xfd   :  { %168 = shalt.err (!%p165_p4)
}
  0xfe   :  { %s169_s9 = scalar_lea.hbm %s253_s5, 16 }
  0xff   :  { %p170_p5 = scmp.ne.s32.totalorder %s253_s5, %s169_s9  ;;  %p173_p6 = scmp.lt.u32.totalorder %s169_s9, %s253_s5 }
 0x101   :  { %p175_p7 = pnand %p173_p6, %p170_p5 }
 0x103   :  { %178 = shalt.err (!%p175_p7)
}
 0x104   :  { %135 = dma.vmem_to_hbm [thread:$0]  %s133_s29, 16, %s253_s5, [#allocation4]  }
 0x105   :  { %179 = dma.done.wait [#allocation4], 16  }
 0x106   :  { %180 = vsyncadd [#allocation4], 4294967280 }
 0x107   :  { %139 = vsyncpa [#allocation4], 1 }

</bundles_post_ra>
